<compile_context>
chip_gen: v7x
topology: tpu7x:2x2x1
jax: 0.10.0
libtpu: 0.0.40
codegen_flags: <defaults>
</compile_context>

<pallas_src>
import functools

import jax
import jax.numpy as jnp
from jax.experimental import pallas as pl
from jax.experimental.pallas import tpu as pltpu

LANE = 128
SUBLANE = 8


def _pad_to(n, m):
    return ((n + m - 1) // m) * m


def mlp_kernel(x_ref, w1_ref, b1_ref, w2_ref, b2_ref, w3_ref, b3_ref, o_ref):
    cdt = w1_ref.dtype  # MXU compute dtype (bf16 by default, f32 optional)
    # fc1 + relu: cast x tile to compute dtype on the VPU, accumulate in f32.
    h1 = jnp.dot(x_ref[...].astype(cdt), w1_ref[...],
                 preferred_element_type=jnp.float32)
    h1 = jnp.maximum(h1 + b1_ref[...], 0.0)          # bias/ReLU stay f32 (v5e-safe)
    # fc2 + relu
    h2 = jnp.dot(h1.astype(cdt), w2_ref[...],
                 preferred_element_type=jnp.float32)
    h2 = jnp.maximum(h2 + b2_ref[...], 0.0)
    # fc3 (no activation). Output padded only to 8 lanes -> masked store but
    # 16x less HBM writeback than padding to 128.
    o = jnp.dot(h2.astype(cdt), w3_ref[...],
                preferred_element_type=jnp.float32)
    o_ref[...] = (o + b3_ref[...]).astype(o_ref.dtype)


def prepare_padded_params(params, *, use_bf16=True):
    """One-time (model-load) padding/casting of weights.

    Hidden dim padded 100->128 (lane-dense), output dim padded 3->8 only.
    Padded bias entries / weight rows / weight columns are zero so the padding
    stays inert through ReLU and the following matmuls.
    """
    w1, b1, w2, b2, w3, b3 = params
    in_f, hidden = w1.shape
    out_q = w3.shape[1]
    H = _pad_to(hidden, LANE)       # 100 -> 128
    O = _pad_to(out_q, SUBLANE)     # 3   -> 8
    f32 = jnp.float32
    w1p = jnp.zeros((in_f, H), f32).at[:, :hidden].set(w1)
    b1p = jnp.zeros((1, H), f32).at[:, :hidden].set(b1.reshape(1, -1))
    w2p = jnp.zeros((H, H), f32).at[:hidden, :hidden].set(w2)
    b2p = jnp.zeros((1, H), f32).at[:, :hidden].set(b2.reshape(1, -1))
    w3p = jnp.zeros((H, O), f32).at[:hidden, :out_q].set(w3)
    b3p = jnp.zeros((1, O), f32).at[:, :out_q].set(b3.reshape(1, -1))
    if use_bf16:
        # bf16 MXU runs at full rate on v5e/v6e/v7x and halves weight VMEM.
        # Biases stay f32: bias-add/ReLU run on the f32 VPU path.
        w1p = w1p.astype(jnp.bfloat16)
        w2p = w2p.astype(jnp.bfloat16)
        w3p = w3p.astype(jnp.bfloat16)
    return (w1p, b1p, w2p, b2p, w3p, b3p)


def pulmonary_model_forward(x, padded_params, *, out_quantiles=3,
                            tile_b=4096, core_parallel=False):
    """Forward pass of PulmonaryModel using pre-padded params (see above)."""
    w1p, b1p, w2p, b2p, w3p, b3p = padded_params
    B, in_f = x.shape
    H = w1p.shape[1]
    O = w3p.shape[1]
    assert out_quantiles <= O

    # Batch tiling. No host-side pad copy: Pallas masks the ragged last tile.
    # If the whole batch fits in one tile, use block == full batch dim (always
    # a legal block shape regardless of divisibility).
    if B <= tile_b:
        TB = B
    else:
        TB = max(SUBLANE, (tile_b // SUBLANE) * SUBLANE)
    grid = (pl.cdiv(B, TB),)

    # Weights/biases: same block every grid step -> stay VMEM-resident.
    def resident(a):
        return pl.BlockSpec(a.shape, lambda i: (0,) * a.ndim)

    flops = 2 * B * (in_f * H + H * H + H * O)
    bytes_accessed = (
        x.nbytes + w1p.nbytes + b1p.nbytes + w2p.nbytes + b2p.nbytes
        + w3p.nbytes + b3p.nbytes + B * O * 4
    )

    # On v7x, core_parallel=True shards batch tiles across the 2 TensorCores.
    dim_sem = (pltpu.CORE_PARALLEL,) if core_parallel else (pltpu.PARALLEL,)

    out_pad = pl.pallas_call(
        mlp_kernel,
        out_shape=jax.ShapeDtypeStruct((B, O), jnp.float32),
        grid_spec=pl.GridSpec(
            grid=grid,
            in_specs=[
                pl.BlockSpec((TB, in_f), lambda i: (i, 0)),   # x: batch-tiled, f32
                resident(w1p), resident(b1p),
                resident(w2p), resident(b2p),
                resident(w3p), resident(b3p),
            ],
            out_specs=pl.BlockSpec((TB, O), lambda i: (i, 0)),
        ),
        compiler_params=pltpu.CompilerParams(dimension_semantics=dim_sem),
        cost_estimate=pl.CostEstimate(
            flops=flops, transcendentals=0, bytes_accessed=bytes_accessed),
    )(x.astype(jnp.float32), w1p, b1p, w2p, b2p, w3p, b3p)

    # Strip the (3 -> 8) lane padding of the quantile output.
    # TODO(synk): if the output DMA is still exposed at large batch, try
    # pipeline_mode=pl.Buffered(3) on the x/out specs and/or a bf16 output.
    return out_pad[:, :out_quantiles]


def init_params(key, in_features=9, hidden=100, out_quantiles=3):
    """Deterministic synthetic init mimicking nn.Linear (stored as [in, out])."""
    ks = jax.random.split(key, 6)

    def uniform(k, shape, fan_in):
        bound = 1.0 / jnp.sqrt(jnp.float32(fan_in))
        return jax.random.uniform(k, shape, jnp.float32, -bound, bound)

    w1 = uniform(ks[0], (in_features, hidden), in_features)
    b1 = uniform(ks[1], (hidden,), in_features)
    w2 = uniform(ks[2], (hidden, hidden), hidden)
    b2 = uniform(ks[3], (hidden,), hidden)
    w3 = uniform(ks[4], (hidden, out_quantiles), hidden)
    b3 = uniform(ks[5], (out_quantiles,), hidden)
    return (w1, b1, w2, b2, w3, b3)


if __name__ == "__main__":
    key = jax.random.PRNGKey(0)
    k_x, k_p = jax.random.split(key)

    B, in_features, out_quantiles = 8, 9, 3
    x = jax.random.normal(k_x, (B, in_features), jnp.float32)
    params = init_params(k_p, in_features=in_features, out_quantiles=out_quantiles)

    # Pure-JAX f32 reference (unpadded math).
    w1, b1, w2, b2, w3, b3 = params
    ref = jnp.maximum(x @ w1 + b1, 0.0)
    ref = jnp.maximum(ref @ w2 + b2, 0.0)
    ref = ref @ w3 + b3

    fwd = jax.jit(functools.partial(pulmonary_model_forward,
                                    out_quantiles=out_quantiles, tile_b=4096))

    # Default serving path: bf16 MXU compute (loose tolerance = bf16 quantization).
    padded_bf16 = prepare_padded_params(params, use_bf16=True)
    out = jax.block_until_ready(fwd(x, padded_bf16))
    assert out.shape == (B, out_quantiles), out.shape
    assert jnp.allclose(out, ref, atol=3e-2, rtol=3e-2), \
        float(jnp.max(jnp.abs(out - ref)))

    # f32 compute path: tight numerical check.
    padded_f32 = prepare_padded_params(params, use_bf16=False)
    out_f32 = jax.block_until_ready(fwd(x, padded_f32))
    assert out_f32.shape == (B, out_quantiles), out_f32.shape
    assert jnp.allclose(out_f32, ref, atol=1e-5, rtol=1e-5), \
        float(jnp.max(jnp.abs(out_f32 - ref)))

    # TODO(synk): for this tiny MLP embedded in a larger jit, letting XLA fuse
    # the three GEMMs (no pallas_call) can still win; keep the Pallas path for
    # large-batch serving.
    print("KERNEL_OK")
</pallas_src>

<mosaic_0001>
module attributes {stable_mosaic.version = 11 : i64} {
  func.func @mlp_kernel(%arg0: i32, %arg1: memref<8x9xf32, #tpu.memory_space<vmem>>, %arg2: memref<9x128xbf16, #tpu.memory_space<vmem>>, %arg3: memref<1x128xf32, #tpu.memory_space<vmem>>, %arg4: memref<128x128xbf16, #tpu.memory_space<vmem>>, %arg5: memref<1x128xf32, #tpu.memory_space<vmem>>, %arg6: memref<128x8xbf16, #tpu.memory_space<vmem>>, %arg7: memref<1x8xf32, #tpu.memory_space<vmem>>, %arg8: memref<8x8xf32, #tpu.memory_space<vmem>>) attributes {dimension_semantics = [#tpu.dimension_semantics<parallel>], iteration_bounds = array<i64: 1>, scalar_prefetch = 0 : i64, scratch_operands = 0 : i64, tpu.core_type = #tpu.core_type<tc>, window_params = [{transform_indices = @transform_0, window_bounds = array<i64: 8, 9>}, {pipeline_mode = #tpu.pipeline_mode<synchronous>, transform_indices = @transform_1, window_bounds = array<i64: 9, 128>}, {pipeline_mode = #tpu.pipeline_mode<synchronous>, transform_indices = @transform_2, window_bounds = array<i64: 1, 128>}, {pipeline_mode = #tpu.pipeline_mode<synchronous>, transform_indices = @transform_3, window_bounds = array<i64: 128, 128>}, {pipeline_mode = #tpu.pipeline_mode<synchronous>, transform_indices = @transform_4, window_bounds = array<i64: 1, 128>}, {pipeline_mode = #tpu.pipeline_mode<synchronous>, transform_indices = @transform_5, window_bounds = array<i64: 128, 8>}, {pipeline_mode = #tpu.pipeline_mode<synchronous>, transform_indices = @transform_6, window_bounds = array<i64: 1, 8>}, {transform_indices = @transform_7, window_bounds = array<i64: 8, 8>}]} {
    %c0 = arith.constant 0 : index
    %c0_0 = arith.constant 0 : index
    %0 = vector.load %arg1[%c0, %c0_0] : memref<8x9xf32, #tpu.memory_space<vmem>>, vector<8x9xf32>
    %1 = arith.truncf %0 : vector<8x9xf32> to vector<8x9xbf16>
    %c0_1 = arith.constant 0 : index
    %c0_2 = arith.constant 0 : index
    %2 = vector.load %arg2[%c0_1, %c0_2] : memref<9x128xbf16, #tpu.memory_space<vmem>>, vector<9x128xbf16>
    %cst = arith.constant dense<0.000000e+00> : vector<8x128xf32>
    %3 = tpu.matmul %1, %2, %cst {dimension_numbers = #tpu.dot_dimension_numbers<[1], [0], [0], [1], [0, 0, 1, 1], [], []>} : vector<8x9xbf16>, vector<9x128xbf16>, vector<8x128xf32> -> vector<8x128xf32>
    %c0_3 = arith.constant 0 : index
    %c0_4 = arith.constant 0 : index
    %4 = vector.load %arg3[%c0_3, %c0_4] : memref<1x128xf32, #tpu.memory_space<vmem>>, vector<1x128xf32>
    %5 = vector.broadcast %4 : vector<1x128xf32> to vector<8x128xf32>
    %6 = arith.addf %3, %5 : vector<8x128xf32>
    %cst_5 = arith.constant 0.000000e+00 : f32
    %7 = vector.broadcast %cst_5 : f32 to vector<8x128xf32>
    %8 = arith.maximumf %6, %7 : vector<8x128xf32>
    %9 = arith.truncf %8 : vector<8x128xf32> to vector<8x128xbf16>
    %c0_6 = arith.constant 0 : index
    %c0_7 = arith.constant 0 : index
    %10 = vector.load %arg4[%c0_6, %c0_7] : memref<128x128xbf16, #tpu.memory_space<vmem>>, vector<128x128xbf16>
    %cst_8 = arith.constant dense<0.000000e+00> : vector<8x128xf32>
    %11 = tpu.matmul %9, %10, %cst_8 {dimension_numbers = #tpu.dot_dimension_numbers<[1], [0], [0], [1], [0, 0, 1, 1], [], []>} : vector<8x128xbf16>, vector<128x128xbf16>, vector<8x128xf32> -> vector<8x128xf32>
    %c0_9 = arith.constant 0 : index
    %c0_10 = arith.constant 0 : index
    %12 = vector.load %arg5[%c0_9, %c0_10] : memref<1x128xf32, #tpu.memory_space<vmem>>, vector<1x128xf32>
    %13 = vector.broadcast %12 : vector<1x128xf32> to vector<8x128xf32>
    %14 = arith.addf %11, %13 : vector<8x128xf32>
    %cst_11 = arith.constant 0.000000e+00 : f32
    %15 = vector.broadcast %cst_11 : f32 to vector<8x128xf32>
    %16 = arith.maximumf %14, %15 : vector<8x128xf32>
    %17 = arith.truncf %16 : vector<8x128xf32> to vector<8x128xbf16>
    %c0_12 = arith.constant 0 : index
    %c0_13 = arith.constant 0 : index
    %18 = vector.load %arg6[%c0_12, %c0_13] : memref<128x8xbf16, #tpu.memory_space<vmem>>, vector<128x8xbf16>
    %cst_14 = arith.constant dense<0.000000e+00> : vector<8x8xf32>
    %19 = tpu.matmul %17, %18, %cst_14 {dimension_numbers = #tpu.dot_dimension_numbers<[1], [0], [0], [1], [0, 0, 1, 1], [], []>} : vector<8x128xbf16>, vector<128x8xbf16>, vector<8x8xf32> -> vector<8x8xf32>
    %c0_15 = arith.constant 0 : index
    %c0_16 = arith.constant 0 : index
    %20 = vector.load %arg7[%c0_15, %c0_16] : memref<1x8xf32, #tpu.memory_space<vmem>>, vector<1x8xf32>
    %21 = vector.broadcast %20 : vector<1x8xf32> to vector<8x8xf32>
    %22 = arith.addf %19, %21 : vector<8x8xf32>
    %c0_17 = arith.constant 0 : index
    %c0_18 = arith.constant 0 : index
    %23 = vector.load %arg8[%c0_17, %c0_18] : memref<8x8xf32, #tpu.memory_space<vmem>>, vector<8x8xf32>
    tpu.vector_store %arg8[%c0_17, %c0_18], %22 {strides = array<i32>} : memref<8x8xf32, #tpu.memory_space<vmem>>, vector<8x8xf32>,
    return
  }
  func.func @transform_0(%arg0: i32) -> (i32, i32) {
    %c0_i32 = arith.constant 0 : i32
    %c0_i32_0 = arith.constant 0 : i32
    return %arg0, %c0_i32 : i32, i32
  }
  func.func @transform_1(%arg0: i32) -> (i32, i32) {
    %c0_i32 = arith.constant 0 : i32
    %c0_i32_0 = arith.constant 0 : i32
    %c0_i32_1 = arith.constant 0 : i32
    return %c0_i32, %c0_i32_0 : i32, i32
  }
  func.func @transform_2(%arg0: i32) -> (i32, i32) {
    %c0_i32 = arith.constant 0 : i32
    %c0_i32_0 = arith.constant 0 : i32
    %c0_i32_1 = arith.constant 0 : i32
    return %c0_i32, %c0_i32_0 : i32, i32
  }
  func.func @transform_3(%arg0: i32) -> (i32, i32) {
    %c0_i32 = arith.constant 0 : i32
    %c0_i32_0 = arith.constant 0 : i32
    %c0_i32_1 = arith.constant 0 : i32
    return %c0_i32, %c0_i32_0 : i32, i32
  }
  func.func @transform_4(%arg0: i32) -> (i32, i32) {
    %c0_i32 = arith.constant 0 : i32
    %c0_i32_0 = arith.constant 0 : i32
    %c0_i32_1 = arith.constant 0 : i32
    return %c0_i32, %c0_i32_0 : i32, i32
  }
  func.func @transform_5(%arg0: i32) -> (i32, i32) {
    %c0_i32 = arith.constant 0 : i32
    %c0_i32_0 = arith.constant 0 : i32
    %c0_i32_1 = arith.constant 0 : i32
    return %c0_i32, %c0_i32_0 : i32, i32
  }
  func.func @transform_6(%arg0: i32) -> (i32, i32) {
    %c0_i32 = arith.constant 0 : i32
    %c0_i32_0 = arith.constant 0 : i32
    %c0_i32_1 = arith.constant 0 : i32
    return %c0_i32, %c0_i32_0 : i32, i32
  }
  func.func @transform_7(%arg0: i32) -> (i32, i32) {
    %c0_i32 = arith.constant 0 : i32
    %c0_i32_0 = arith.constant 0 : i32
    return %arg0, %c0_i32 : i32, i32
  }
}

</mosaic_0001>

<bundles_post_ra>
// kernel: pulmonary_model_forward.1
= control target key start
LH: loop header
LB: loop body
LE: loop exit
PB: predicated region body
PF: predicated region fallthrough
CT: control target
= control target key end

     0   :  { %12 = vsyncpa [#allocation3], 0  ;;  %s475_s24 = smov [#allocation2]   ;;  %s619_s0 = inlined_call_operand.vmem [shape: f32[8,9], index: 0, kind: input, shape index: {}]   ;;  %s620_s1 = inlined_call_operand.hbm [shape: bf16[9,128], index: 1, kind: input, shape index: {}]   ;;  %s621_s2 = inlined_call_operand.vmem [shape: f32[1,128], index: 2, kind: input, shape index: {}]   ;;  %s622_s3 = inlined_call_operand.vmem [shape: bf16[128,128], index: 3, kind: input, shape index: {}]   ;;  %s623_s4 = inlined_call_operand.vmem [shape: f32[1,128], index: 4, kind: input, shape index: {}]   ;;  %s624_s5 = inlined_call_operand.vmem [shape: bf16[128,8], index: 5, kind: input, shape index: {}]   ;;  %s625_s6 = inlined_call_operand.vmem [shape: f32[1,8], index: 6, kind: input, shape index: {}]   ;;  %s626_s7 = inlined_call_operand.vmem [shape: f32[8,8], index: 7, kind: output, shape index: {}]  }
   0x1   :  { %s20_s25 = sshll.u32 %s475_s24, 4  ;;  %s451_s28 = scalar_lea.hbm %s620_s1, 128  ;;  %s21_s25 = int_to_ptr.vmem [resolvable:$true] %s20_s25 }
   0x2   :  { %p452_p0 = scmp.ne.s32.totalorder %s620_s1, %s451_s28  ;;  %p455_p1 = scmp.lt.u32.totalorder %s451_s28, %s620_s1 }
   0x4   :  { %p457_p2 = pnand %p455_p1, %p452_p0 }
   0x6   :  { %460 = shalt.err (!%p457_p2)
}
   0x7   :  { %s461_s10 = scalar_lea.vmem %s21_s25, 128  ;;  %p466_p4 = scmp.lt.s32.totalorder %s21_s25, %s21_s25 }
   0x8   :  { %p462_p3 = scmp.ne.s32.totalorder %s21_s25, %s461_s10  ;;  %p467_p5 = scmp.lt.s32.totalorder %s461_s10, %s461_s10 }
   0xa   :  { %p468_p6 = por %p467_p5, %p466_p4 }
   0xc   :  { %p469_p7 = pnand %p468_p6, %p462_p3 }
   0xe   :  { %472 = shalt.err (!%p469_p7)
}
   0xf   :  { %s476_s11 = smov 64   ;;  %s477_s12 = smov 4  }
  0x10   :  { %26 = dma.hbm_to_vmem [thread:$0]  %s620_s1, 128, %s21_s25, [#allocation3], %s476_s11, %s476_s11, %s477_s12  }
  0x11   :  { %473 = dma.done.wait [#allocation3], 128  }
  0x12   :  { %474 = vsyncadd [#allocation3], 4294967168  ;;  %vm61_vm0 = vcmask 1043456   ;;  %v478_v0 = vmov 0.0   ;;  %vm479_vm1 = vmmov 0   ;;  %vm62_vm2 = vcmask 1044480  }
  0x13   :  { %382 = vmatprep.subr.bf16.mxu0 %v478_v0  ;;  %388 = vmatprep.subr.bf16.mxu1 %v478_v0  ;;  %v480_v1 = vmov 65535   ;;  %v434_v4 = vld [vmem:[#allocation2] sm:$0x1f]   ;;  %vm57_vm3 = vcmask 72704   ;;  %v436_v9 = vld [vmem:[%s622_s3 + $0x8] sm:$0xff]   ;;  %v437_v10 = vld [vmem:[%s622_s3 + $0x10] sm:$0xff]  }
  0x14   :  { %384 = vmatprep.mubr.msk.bf16.mxu0 %vm479_vm1, %v478_v0  ;;  %404 = vmatprep.mubr.msk.bf16.mxu1 %vm479_vm1, %v478_v0  ;;  %v63_v2 = vsel %vm61_vm0, 4294967295, %v480_v1  ;;  %v41_v5 = vld [vmem:[%s619_s0] sm:$0xff]  ;;  %v438_v11 = vld [vmem:[%s622_s3 + $0x18] sm:$0xff]   ;;  %v440_v13 = vld [vmem:[%s622_s3 + $0x28] sm:$0xff]   ;;  %vm334_vm4 = vcmask 64512  }
  0x15   :  { %v64_v3 = vsel %vm62_vm2, %v63_v2, 0  ;;  %v435_v7 = vld [vmem:[%s622_s3] sm:$0xff]   ;;  %v42_v8 = vpack.c.bf16 %v41_v5, %v41_v5  ;;  %v441_v14 = vld [vmem:[%s622_s3 + $0x30] sm:$0xff]   ;;  %v442_v15 = vld [vmem:[%s622_s3 + $0x38] sm:$0xff]  }
  0x16   :  { %v66_v6 = vand.u32 %v434_v4, %v64_v3  ;;  %389 = vmatpush3.bf16.msra.mxu1 %v435_v7  ;;  %v439_v12 = vld [vmem:[%s622_s3 + $0x20] sm:$0xff]   ;;  %v444_v17 = vld [vmem:[%s624_s5 + $0x8] sm:$0xff]   ;;  %v445_v18 = vld [vmem:[%s624_s5 + $0x10] sm:$0xff]  }
  0x17   :  { %390 = vmatprep.subr.bf16.mxu1 %v478_v0  ;;  %v443_v16 = vld [vmem:[%s624_s5] sm:$0xff]   ;;  %v446_v19 = vld [vmem:[%s624_s5 + $0x18] sm:$0xff]   ;;  %v448_v21 = vld [vmem:[%s624_s5 + $0x28] sm:$0xff]  }
  0x18   :  { %383 = vmatpush3.bf16.msra.mxu0 %v66_v6  ;;  %v447_v20 = vld [vmem:[%s624_s5 + $0x20] sm:$0xff]   ;;  %v449_v30 = vld [vmem:[%s624_s5 + $0x30] sm:$0xff]   ;;  %v450_v31 = vld [vmem:[%s624_s5 + $0x38] sm:$0xff]  }
  0x19   :  { %408 = vmatprep.subr.bf16.mxu0 %v478_v0  ;;  %v341_v22 = vld [vmem:[%s621_s2] ss:$0 sm:$0xff] }
  0x1a   :  { %391 = vmatpush3.bf16.msra.mxu1 %v436_v9  ;;  %v344_v32 = vld [vmem:[%s623_s4] ss:$0 sm:$0xff] }
  0x1b   :  { %385 = vmatmul.mubr.msk.bf16.vlgmr.msra.gmra.mrb[0].mxu0 %vm57_vm3, %v42_v8  ;;  %392 = vmatprep.subr.bf16.mxu1 %v478_v0  ;;  %v353_v40 = vld [vmem:[%s625_s6] ss:$0 sm:$0xff] }
  0x1c   :  { %424 = vmatprep.mubr.msk.bf16.mxu0 %vm479_vm1, %v478_v0  ;;  %409 = vmatpush3.bf16.msra.mxu0 %v443_v16 }
  0x1d   :  { %410 = vmatprep.subr.bf16.mxu0 %v478_v0 }
  0x1e   :  { %393 = vmatpush3.bf16.msra.mxu1 %v437_v10 }
  0x1f   :  { %394 = vmatprep.subr.bf16.mxu1 %v478_v0 }
  0x20   :  { %411 = vmatpush3.bf16.msra.mxu0 %v444_v17 }
  0x21   :  { %412 = vmatprep.subr.bf16.mxu0 %v478_v0 }
  0x22   :  { %395 = vmatpush3.bf16.msra.mxu1 %v438_v11 }
  0x23   :  { %396 = vmatprep.subr.bf16.mxu1 %v478_v0 }
  0x24   :  { %413 = vmatpush3.bf16.msra.mxu0 %v445_v18 }
  0x25   :  { %414 = vmatprep.subr.bf16.mxu0 %v478_v0 }
  0x26   :  { %397 = vmatpush3.bf16.msra.mxu1 %v439_v12 }
  0x27   :  { %398 = vmatprep.subr.bf16.mxu1 %v478_v0 }
  0x28   :  { %415 = vmatpush3.bf16.msra.mxu0 %v446_v19 }
  0x29   :  { %416 = vmatprep.subr.bf16.mxu0 %v478_v0 }
  0x2a   :  { %399 = vmatpush3.bf16.msra.mxu1 %v440_v13 }
  0x2b   :  { %400 = vmatprep.subr.bf16.mxu1 %v478_v0 }
  0x2c   :  { %417 = vmatpush3.bf16.msra.mxu0 %v447_v20 }
  0x2d   :  { %418 = vmatprep.subr.bf16.mxu0 %v478_v0 }
  0x2e   :  { %401 = vmatpush3.bf16.msra.mxu1 %v441_v14 }
  0x2f   :  { %402 = vmatprep.subr.bf16.mxu1 %v478_v0 }
  0x30   :  { %419 = vmatpush3.bf16.msra.mxu0 %v448_v21 }
  0x31   :  { %420 = vmatprep.subr.bf16.mxu0 %v478_v0 }
  0x32   :  { %403 = vmatpush3.bf16.msra.mxu1 %v442_v15 }
  0x34   :  { %421 = vmatpush3.bf16.msra.mxu0 %v449_v30 }
  0x35   :  { %422 = vmatprep.subr.bf16.mxu0 %v478_v0 }
  0x38   :  { %423 = vmatpush3.bf16.msra.mxu0 %v450_v31 }
  0xee   :  { %v102_v23 = vpop.f32.mrb[0].mxu0 }
  0xef   :  { %v103_v24 = vadd.f32 %v341_v22, %v102_v23  ;;  %v386_v25 = vpop.f32.mrb[1].mxu0 }
  0xf0   :  { %v105_v26 = vpop.f32.mrb[2].mxu0 }
  0xf1   :  { %v108_v27 = vmax.f32 %v103_v24, 0.0  ;;  %v387_v28 = vpop.f32.mrb[3].mxu0 }
  0xf3   :  { %v109_v29 = vpack.c.bf16 %v108_v27, %v108_v27 }
  0xf5   :  { %405 = vmatmul.mubr.bf16.vlgmr.msra.gmra.mrb[0].mxu1 %v109_v29 }
 0x1c8   :  { %v215_v33 = vpop.f32.mrb[0].mxu1 }
 0x1c9   :  { %v216_v34 = vadd.f32 %v344_v32, %v215_v33  ;;  %v406_v35 = vpop.f32.mrb[1].mxu1 }
 0x1ca   :  { %v218_v36 = vpop.f32.mrb[2].mxu1 }
 0x1cb   :  { %v221_v37 = vmax.f32 %v216_v34, 0.0  ;;  %v407_v38 = vpop.f32.mrb[3].mxu1 }
 0x1cd   :  { %v222_v39 = vpack.c.bf16 %v221_v37, %v221_v37 }
 0x1cf   :  { %425 = vmatmul.mubr.bf16.vlgmr.msra.gmra.mrb[4].mxu0 %v222_v39 }
 0x2a2   :  { %v328_v41 = vpop.f32.mrb[4].mxu0 }
 0x2a3   :  { %v329_v42 = vadd.f32 %v353_v40, %v328_v41  ;;  %v426_v43 = vpop.f32.mrb[5].mxu0 }
 0x2a4   :  { %v331_v44 = vpop.f32.mrb[6].mxu0 }
 0x2a5   :  { %335 = vst.msk [vmem:[%s626_s7] sm:$0xff] %vm334_vm4, %v329_v42  ;;  %v427_v45 = vpop.f32.mrb[7].mxu0 }
 0x2a6   :  { %340 = vsyncpa [#allocation3], 1 }

</bundles_post_ra>
